<compile_context>
chip_gen: v6e
topology: v6e:2x2x1
jax: 0.10.0
libtpu: 0.0.40
codegen_flags: <defaults>
</compile_context>

<pallas_src>
import jax
import jax.numpy as jnp
from jax.experimental import pallas as pl
from jax.experimental.pallas import tpu as pltpu


def vae_encoder_kernel(x_ref, w1_ref, b1_ref, w2_ref, b2_ref, w3_ref, b3_ref,
                       mu_ref):
    # x arrives as f32 straight from HBM (no wrapper pad/cast pass); cast in-VMEM.
    x = x_ref[...].astype(jnp.bfloat16)
    # fc1 + relu (bf16 operands, f32 MXU accumulation)
    h1 = jnp.dot(x, w1_ref[...], preferred_element_type=jnp.float32)
    h1 = jnp.maximum(h1 + b1_ref[...].astype(jnp.float32), 0.0).astype(jnp.bfloat16)
    # fc2 + relu
    h2 = jnp.dot(h1, w2_ref[...], preferred_element_type=jnp.float32)
    h2 = jnp.maximum(h2 + b2_ref[...].astype(jnp.float32), 0.0).astype(jnp.bfloat16)
    # fc3 -> mu_z (lane-dense padded output columns, f32 store)
    mu = jnp.dot(h2, w3_ref[...], preferred_element_type=jnp.float32)
    mu_ref[...] = (mu + b3_ref[...].astype(jnp.float32)).astype(mu_ref.dtype)


def _round_up(n, m):
    return ((n + m - 1) // m) * m


def _choose_batch_tile(B):
    if B <= 256:
        # Single full-batch block: block dim == full dim, so no (8,128) alignment
        # constraint and no batch padding needed.
        return B
    # 512-1024 row tiles for large batches (amortizes the ~0.35us per-step overhead),
    # capped near B//2 so the grid keeps >= 2 steps -> v7x megacore split stays usable.
    tb = min(1024, max(256, _round_up(B // 2, 256)))
    return tb


def prepare_params(params):
    """One-time cast/pad of weights into the kernel layout (call once, reuse).

    Weights are stored [in, out] (kernel computes x @ W + b), cast to bf16; only the
    tiny fc3 output dim is lane-padded to 128 so the mu store is unmasked.
    """
    w1, b1, w2, b2, w3, b3 = params
    z_dim = w3.shape[1]
    Zp = _round_up(z_dim, 128)
    dt = jnp.bfloat16

    w1p = w1.astype(dt)                                   # (784, 512)
    b1p = b1.reshape(1, -1).astype(dt)                    # (1, 512)
    w2p = w2.astype(dt)                                   # (512, 128)
    b2p = b2.reshape(1, -1).astype(dt)                    # (1, 128)
    w3p = jnp.zeros((w3.shape[0], Zp), dt).at[:, :z_dim].set(w3.astype(dt))
    b3p = jnp.zeros((1, Zp), dt).at[:, :z_dim].set(b3.reshape(1, -1).astype(dt))
    return (w1p, b1p, w2p, b2p, w3p, b3p, z_dim)


def vae_encoder_forward(x, prepared, *, batch_tile=None):
    """Returns (mu_z, sigma_z) matching the PyTorch VAEEncoder.forward."""
    w1p, b1p, w2p, b2p, w3p, b3p, z_dim = prepared
    B, K = x.shape                       # K = 784
    H1 = w1p.shape[1]                    # 512
    H2 = w2p.shape[1]                    # 128
    Zp = w3p.shape[1]                    # z_dim padded to 128

    TB = batch_tile if batch_tile is not None else _choose_batch_tile(B)
    Bp = _round_up(B, TB)
    # Only pad the batch axis when TB does not divide B (no-op in the common case).
    xp = x if Bp == B else jnp.zeros((Bp, K), x.dtype).at[:B].set(x)

    fixed = lambda i: (0, 0)   # weights/biases: same block every step -> VMEM-resident
    # TODO(synk): weight specs could use pipeline_mode=pl.Buffered(1) (single-buffer the
    # invariant weights) for ~1 MiB extra VMEM headroom; omitted as a minor win.

    mu_pad = pl.pallas_call(
        vae_encoder_kernel,
        out_shape=jax.ShapeDtypeStruct((Bp, Zp), jnp.float32),
        grid=(Bp // TB,),
        in_specs=[
            pl.BlockSpec((TB, K), lambda i: (i, 0)),     # x tile (784 = full last dim)
            pl.BlockSpec((K, H1), fixed),                # w1
            pl.BlockSpec((1, H1), fixed),                # b1
            pl.BlockSpec((H1, H2), fixed),               # w2
            pl.BlockSpec((1, H2), fixed),                # b2
            pl.BlockSpec((H2, Zp), fixed),               # w3 (lane-padded cols)
            pl.BlockSpec((1, Zp), fixed),                # b3 (lane-padded cols)
        ],
        out_specs=pl.BlockSpec((TB, Zp), lambda i: (i, 0)),
        compiler_params=pltpu.CompilerParams(
            dimension_semantics=("parallel",),
            vmem_limit_bytes=32 * 1024 * 1024,
        ),
    )(xp, w1p, b1p, w2p, b2p, w3p, b3p)

    mu = mu_pad[:B, :z_dim]
    # sigma_z = softplus(0.1) broadcast -- pure constant per the module spec.
    sigma_val = jnp.log1p(jnp.exp(jnp.float32(0.1)))
    sigma = jnp.full((B, z_dim), sigma_val, dtype=jnp.float32)
    return mu, sigma


def init_params(key, z_dim):
    # Mimic torch.nn.Linear default init: U(-1/sqrt(fan_in), 1/sqrt(fan_in)).
    # Weights stored as [in, out]; biases as (1, out) for clean broadcast.
    dims = [(784, 512), (512, 128), (128, z_dim)]
    params = []
    for i, (fan_in, fan_out) in enumerate(dims):
        kw, kb = jax.random.split(jax.random.fold_in(key, i))
        bound = 1.0 / jnp.sqrt(jnp.float32(fan_in))
        w = jax.random.uniform(kw, (fan_in, fan_out), jnp.float32, -bound, bound)
        b = jax.random.uniform(kb, (1, fan_out), jnp.float32, -bound, bound)
        params += [w, b]
    return tuple(params)


if __name__ == "__main__":
    key = jax.random.PRNGKey(0)
    z_dim = 32
    batch = 8

    k_in, k_par = jax.random.split(key)
    x = jax.random.normal(k_in, (batch, 784), dtype=jnp.float32)
    params = init_params(k_par, z_dim)
    prepared = prepare_params(params)      # one-time weight cast/pad (hoisted)

    mu_z, sigma_z = vae_encoder_forward(x, prepared)
    jax.block_until_ready((mu_z, sigma_z))

    # Plain-JAX reference replicating the kernel's bf16 operand quantization.
    w1, b1, w2, b2, w3, b3 = params
    q = lambda a: a.astype(jnp.bfloat16).astype(jnp.float32)
    h1 = q(jnp.maximum(q(x) @ q(w1) + q(b1), 0.0))
    h2 = q(jnp.maximum(h1 @ q(w2) + q(b2), 0.0))
    mu_ref = h2 @ q(w3) + q(b3)
    sigma_ref = jnp.full_like(mu_ref, jnp.log1p(jnp.exp(0.1)))

    assert mu_z.shape == (batch, z_dim) and sigma_z.shape == (batch, z_dim)
    assert jnp.allclose(mu_z, mu_ref, atol=5e-3, rtol=5e-3)
    assert jnp.allclose(sigma_z, sigma_ref, atol=1e-6)

    print("KERNEL_OK")
</pallas_src>

<mosaic_0001>
module attributes {stable_mosaic.version = 11 : i64} {
  func.func @vae_encoder_kernel(%arg0: i32, %arg1: memref<8x784xf32, #tpu.memory_space<vmem>>, %arg2: memref<784x512xbf16, #tpu.memory_space<vmem>>, %arg3: memref<1x512xbf16, #tpu.memory_space<vmem>>, %arg4: memref<512x128xbf16, #tpu.memory_space<vmem>>, %arg5: memref<1x128xbf16, #tpu.memory_space<vmem>>, %arg6: memref<128x128xbf16, #tpu.memory_space<vmem>>, %arg7: memref<1x128xbf16, #tpu.memory_space<vmem>>, %arg8: memref<8x128xf32, #tpu.memory_space<vmem>>) attributes {dimension_semantics = [#tpu.dimension_semantics<parallel>], iteration_bounds = array<i64: 1>, scalar_prefetch = 0 : i64, scratch_operands = 0 : i64, tpu.core_type = #tpu.core_type<tc>, window_params = [{transform_indices = @transform_0, window_bounds = array<i64: 8, 784>}, {pipeline_mode = #tpu.pipeline_mode<synchronous>, transform_indices = @transform_1, window_bounds = array<i64: 784, 512>}, {pipeline_mode = #tpu.pipeline_mode<synchronous>, transform_indices = @transform_2, window_bounds = array<i64: 1, 512>}, {pipeline_mode = #tpu.pipeline_mode<synchronous>, transform_indices = @transform_3, window_bounds = array<i64: 512, 128>}, {pipeline_mode = #tpu.pipeline_mode<synchronous>, transform_indices = @transform_4, window_bounds = array<i64: 1, 128>}, {pipeline_mode = #tpu.pipeline_mode<synchronous>, transform_indices = @transform_5, window_bounds = array<i64: 128, 128>}, {pipeline_mode = #tpu.pipeline_mode<synchronous>, transform_indices = @transform_6, window_bounds = array<i64: 1, 128>}, {transform_indices = @transform_7, window_bounds = array<i64: 8, 128>}]} {
    %c0 = arith.constant 0 : index
    %c0_0 = arith.constant 0 : index
    %0 = vector.load %arg1[%c0, %c0_0] : memref<8x784xf32, #tpu.memory_space<vmem>>, vector<8x784xf32>
    %1 = arith.truncf %0 : vector<8x784xf32> to vector<8x784xbf16>
    %c0_1 = arith.constant 0 : index
    %c0_2 = arith.constant 0 : index
    %2 = vector.load %arg2[%c0_1, %c0_2] : memref<784x512xbf16, #tpu.memory_space<vmem>>, vector<784x512xbf16>
    %cst = arith.constant dense<0.000000e+00> : vector<8x512xf32>
    %3 = tpu.matmul %1, %2, %cst {dimension_numbers = #tpu.dot_dimension_numbers<[1], [0], [0], [1], [0, 0, 1, 1], [], []>} : vector<8x784xbf16>, vector<784x512xbf16>, vector<8x512xf32> -> vector<8x512xf32>
    %c0_3 = arith.constant 0 : index
    %c0_4 = arith.constant 0 : index
    %4 = vector.load %arg3[%c0_3, %c0_4] : memref<1x512xbf16, #tpu.memory_space<vmem>>, vector<1x512xbf16>
    %5 = arith.extf %4 : vector<1x512xbf16> to vector<1x512xf32>
    %6 = vector.broadcast %5 : vector<1x512xf32> to vector<8x512xf32>
    %7 = arith.addf %3, %6 : vector<8x512xf32>
    %cst_5 = arith.constant 0.000000e+00 : f32
    %8 = vector.broadcast %cst_5 : f32 to vector<8x512xf32>
    %9 = arith.maximumf %7, %8 : vector<8x512xf32>
    %10 = arith.truncf %9 : vector<8x512xf32> to vector<8x512xbf16>
    %c0_6 = arith.constant 0 : index
    %c0_7 = arith.constant 0 : index
    %11 = vector.load %arg4[%c0_6, %c0_7] : memref<512x128xbf16, #tpu.memory_space<vmem>>, vector<512x128xbf16>
    %cst_8 = arith.constant dense<0.000000e+00> : vector<8x128xf32>
    %12 = tpu.matmul %10, %11, %cst_8 {dimension_numbers = #tpu.dot_dimension_numbers<[1], [0], [0], [1], [0, 0, 1, 1], [], []>} : vector<8x512xbf16>, vector<512x128xbf16>, vector<8x128xf32> -> vector<8x128xf32>
    %c0_9 = arith.constant 0 : index
    %c0_10 = arith.constant 0 : index
    %13 = vector.load %arg5[%c0_9, %c0_10] : memref<1x128xbf16, #tpu.memory_space<vmem>>, vector<1x128xbf16>
    %14 = arith.extf %13 : vector<1x128xbf16> to vector<1x128xf32>
    %15 = vector.broadcast %14 : vector<1x128xf32> to vector<8x128xf32>
    %16 = arith.addf %12, %15 : vector<8x128xf32>
    %cst_11 = arith.constant 0.000000e+00 : f32
    %17 = vector.broadcast %cst_11 : f32 to vector<8x128xf32>
    %18 = arith.maximumf %16, %17 : vector<8x128xf32>
    %19 = arith.truncf %18 : vector<8x128xf32> to vector<8x128xbf16>
    %c0_12 = arith.constant 0 : index
    %c0_13 = arith.constant 0 : index
    %20 = vector.load %arg6[%c0_12, %c0_13] : memref<128x128xbf16, #tpu.memory_space<vmem>>, vector<128x128xbf16>
    %cst_14 = arith.constant dense<0.000000e+00> : vector<8x128xf32>
    %21 = tpu.matmul %19, %20, %cst_14 {dimension_numbers = #tpu.dot_dimension_numbers<[1], [0], [0], [1], [0, 0, 1, 1], [], []>} : vector<8x128xbf16>, vector<128x128xbf16>, vector<8x128xf32> -> vector<8x128xf32>
    %c0_15 = arith.constant 0 : index
    %c0_16 = arith.constant 0 : index
    %22 = vector.load %arg7[%c0_15, %c0_16] : memref<1x128xbf16, #tpu.memory_space<vmem>>, vector<1x128xbf16>
    %23 = arith.extf %22 : vector<1x128xbf16> to vector<1x128xf32>
    %24 = vector.broadcast %23 : vector<1x128xf32> to vector<8x128xf32>
    %25 = arith.addf %21, %24 : vector<8x128xf32>
    %c0_17 = arith.constant 0 : index
    %c0_18 = arith.constant 0 : index
    %26 = vector.load %arg8[%c0_17, %c0_18] : memref<8x128xf32, #tpu.memory_space<vmem>>, vector<8x128xf32>
    tpu.vector_store %arg8[%c0_17, %c0_18], %25 {strides = array<i32>} : memref<8x128xf32, #tpu.memory_space<vmem>>, vector<8x128xf32>,
    return
  }
  func.func @transform_0(%arg0: i32) -> (i32, i32) {
    %c0_i32 = arith.constant 0 : i32
    %c0_i32_0 = arith.constant 0 : i32
    return %arg0, %c0_i32 : i32, i32
  }
  func.func @transform_1(%arg0: i32) -> (i32, i32) {
    %c0_i32 = arith.constant 0 : i32
    %c0_i32_0 = arith.constant 0 : i32
    %c0_i32_1 = arith.constant 0 : i32
    return %c0_i32, %c0_i32_0 : i32, i32
  }
  func.func @transform_2(%arg0: i32) -> (i32, i32) {
    %c0_i32 = arith.constant 0 : i32
    %c0_i32_0 = arith.constant 0 : i32
    %c0_i32_1 = arith.constant 0 : i32
    return %c0_i32, %c0_i32_0 : i32, i32
  }
  func.func @transform_3(%arg0: i32) -> (i32, i32) {
    %c0_i32 = arith.constant 0 : i32
    %c0_i32_0 = arith.constant 0 : i32
    %c0_i32_1 = arith.constant 0 : i32
    return %c0_i32, %c0_i32_0 : i32, i32
  }
  func.func @transform_4(%arg0: i32) -> (i32, i32) {
    %c0_i32 = arith.constant 0 : i32
    %c0_i32_0 = arith.constant 0 : i32
    %c0_i32_1 = arith.constant 0 : i32
    return %c0_i32, %c0_i32_0 : i32, i32
  }
  func.func @transform_5(%arg0: i32) -> (i32, i32) {
    %c0_i32 = arith.constant 0 : i32
    %c0_i32_0 = arith.constant 0 : i32
    %c0_i32_1 = arith.constant 0 : i32
    return %c0_i32, %c0_i32_0 : i32, i32
  }
  func.func @transform_6(%arg0: i32) -> (i32, i32) {
    %c0_i32 = arith.constant 0 : i32
    %c0_i32_0 = arith.constant 0 : i32
    %c0_i32_1 = arith.constant 0 : i32
    return %c0_i32, %c0_i32_0 : i32, i32
  }
  func.func @transform_7(%arg0: i32) -> (i32, i32) {
    %c0_i32 = arith.constant 0 : i32
    %c0_i32_0 = arith.constant 0 : i32
    return %arg0, %c0_i32 : i32, i32
  }
}

</mosaic_0001>

<bundles_post_ra>
// kernel: tpu_custom_call.1
= control target key start
LH: loop header
LB: loop body
LE: loop exit
PB: predicated region body
PF: predicated region fallthrough
CT: control target
= control target key end

     0   :  { %12 = vsyncpa [#allocation3], 0  ;;  %s3043_s0 = inlined_call_operand.hbm [shape: f32[8,784], index: 0, kind: input, shape index: {}]   ;;  %s3044_s1 = inlined_call_operand.hbm [shape: bf16[784,512], index: 1, kind: input, shape index: {}]   ;;  %s3045_s2 = inlined_call_operand.hbm [shape: bf16[1,512], index: 2, kind: input, shape index: {}]   ;;  %s3046_s3 = inlined_call_operand.hbm [shape: bf16[512,128], index: 3, kind: input, shape index: {}]   ;;  %s3047_s4 = inlined_call_operand.vmem [shape: bf16[1,128], index: 4, kind: input, shape index: {}]   ;;  %s3048_s5 = inlined_call_operand.hbm [shape: bf16[128,128], index: 5, kind: input, shape index: {}]   ;;  %s3049_s6 = inlined_call_operand.vmem [shape: bf16[1,128], index: 6, kind: input, shape index: {}]   ;;  %s3050_s7 = inlined_call_operand.hbm [shape: f32[8,128], index: 7, kind: output, shape index: {}]  }
   0x1   :  { %13 = vsyncpa [#allocation6], 0 }
   0x2   :  { %14 = vsyncpa [#allocation9], 0 }
   0x3   :  { %15 = vsyncpa [#allocation4], 0  ;;  %s2919_s24 = smov [#allocation5]  }
   0x4   :  { %s31_s25 = sshll.u32 %s2919_s24, 4  ;;  %s32_s25 = int_to_ptr.vmem [resolvable:$true] %s31_s25 }
   0x5   :  { %s2799_s26 = scalar_lea.vmem %s32_s25, 25088  ;;  %p2804_p1 = scmp.lt.s32.totalorder %s32_s25, %s32_s25 }
   0x6   :  { %p2800_p0 = scmp.ne.s32.totalorder %s32_s25, %s2799_s26  ;;  %p2805_p2 = scmp.lt.s32.totalorder %s2799_s26, %s2799_s26 }
   0x8   :  { %p2806_p3 = por %p2805_p2, %p2804_p1 }
   0xa   :  { %p2807_p4 = pnand %p2806_p3, %p2800_p0 }
   0xc   :  { %2810 = shalt.err (!%p2807_p4)
}
   0xd   :  { %s2920_s27 = smov 256   ;;  %s2921_s28 = smov 16  }
   0xe   :  { %37 = dma.hbm_to_vmem [thread:$0]  %s3044_s1, 25088, %s32_s25, [#allocation6], %s2920_s27, %s2920_s27, %s2921_s28  }
   0xf   :  { %s2922_s8 = smov [#allocation8]  }
  0x10   :  { %s53_s9 = sshll.u32 %s2922_s8, 4  ;;  %s54_s9 = int_to_ptr.vmem [resolvable:$true] %s53_s9 }
  0x11   :  { %s2819_s10 = scalar_lea.vmem %s54_s9, 4096  ;;  %p2824_p6 = scmp.lt.s32.totalorder %s54_s9, %s54_s9 }
  0x12   :  { %p2820_p5 = scmp.ne.s32.totalorder %s54_s9, %s2819_s10  ;;  %p2825_p7 = scmp.lt.s32.totalorder %s2819_s10, %s2819_s10 }
  0x14   :  { %p2826_p8 = por %p2825_p7, %p2824_p6 }
  0x16   :  { %p2827_p9 = pnand %p2826_p8, %p2820_p5 }
  0x18   :  { %2830 = shalt.err (!%p2827_p9)
}
  0x19   :  { %s2923_s11 = smov 64   ;;  %s2924_s12 = smov 4  }
  0x1a   :  { %59 = dma.hbm_to_vmem [thread:$0]  %s3046_s3, 4096, %s54_s9, [#allocation9], %s2923_s11, %s2923_s11, %s2924_s12  }
  0x1b   :  { %s2925_s1 = smov [#allocation2]   ;;  %s2926_s16 = smov [#allocation7]  }
  0x1c   :  { %s22_s15 = sshll.u32 %s2925_s1, 4  ;;  %s44_s17 = sshll.u32 %s2926_s16, 4  ;;  %s23_s15 = int_to_ptr.vmem [resolvable:$true] %s22_s15  ;;  %s45_s17 = int_to_ptr.vmem [resolvable:$true] %s44_s17 }
  0x1d   :  { %s2839_s18 = scalar_lea.vmem %s23_s15, 896  ;;  %p2844_p11 = scmp.lt.s32.totalorder %s23_s15, %s23_s15 }
  0x1e   :  { %p2840_p10 = scmp.ne.s32.totalorder %s23_s15, %s2839_s18  ;;  %p2845_p12 = scmp.lt.s32.totalorder %s2839_s18, %s2839_s18 }
  0x20   :  { %p2846_p13 = por %p2845_p12, %p2844_p11 }
  0x22   :  { %p2847_p0 = pnand %p2846_p13, %p2840_p10 }
  0x24   :  { %2850 = shalt.err (!%p2847_p0)
}
  0x25   :  { %25 = dma.hbm_to_vmem [thread:$0]  %s3043_s0, 896, %s23_s15, [#allocation3]  }
  0x26   :  { %s2859_s21 = scalar_lea.vmem %s45_s17, 64  ;;  %p2864_p2 = scmp.lt.s32.totalorder %s45_s17, %s45_s17 }
  0x27   :  { %p2860_p1 = scmp.ne.s32.totalorder %s45_s17, %s2859_s21  ;;  %p2865_p3 = scmp.lt.s32.totalorder %s2859_s21, %s2859_s21 }
  0x29   :  { %p2866_p4 = por %p2865_p3, %p2864_p2 }
  0x2b   :  { %p2867_p5 = pnand %p2866_p4, %p2860_p1 }
  0x2d   :  { %2870 = shalt.err (!%p2867_p5)
}
  0x2e   :  { %47 = dma.hbm_to_vmem [thread:$0]  %s3045_s2, 64, %s45_s17, [#allocation6]  }
  0x2f   :  { %s2927_s23 = smov [#allocation10]  }
  0x30   :  { %s67_s24 = sshll.u32 %s2927_s23, 4  ;;  %s68_s24 = int_to_ptr.vmem [resolvable:$true] %s67_s24 }
  0x31   :  { %s2879_s25 = scalar_lea.vmem %s68_s24, 1024  ;;  %p2884_p7 = scmp.lt.s32.totalorder %s68_s24, %s68_s24 }
  0x32   :  { %p2880_p6 = scmp.ne.s32.totalorder %s68_s24, %s2879_s25  ;;  %p2885_p8 = scmp.lt.s32.totalorder %s2879_s25, %s2879_s25 }
  0x34   :  { %p2886_p9 = por %p2885_p8, %p2884_p7 }
  0x36   :  { %p2887_p10 = pnand %p2886_p9, %p2880_p6 }
  0x38   :  { %2890 = shalt.err (!%p2887_p10)
}
  0x39   :  { %73 = dma.hbm_to_vmem [thread:$0]  %s3048_s5, 1024, %s68_s24, [#allocation9], %s2923_s11, %s2923_s11, %s2924_s12  }
  0x3a   :  { %2911 = dma.done.wait [#allocation3], 896  }
  0x3b   :  { %2912 = vsyncadd [#allocation3], 4294966400 }
  0x3c   :  { %2913 = dma.done.wait [#allocation6], 25152  }
  0x3d   :  { %2914 = vsyncadd [#allocation6], 4294942144 }
  0x3e   :  { %2915 = dma.done.wait [#allocation9], 5120  }
  0x3f   :  { %2916 = vsyncadd [#allocation9], 4294962176  ;;  %v2457_v0 = vld [vmem:[#allocation5 + $0xe4] ss:$16 sps:$4 sm:$0xff]   ;;  %v2461_v2 = vld [vmem:[#allocation5 + $0xe0] ss:$16 sps:$4 sm:$0xff]  }
  0x40   :  { %v2459_v1 = vld [vmem:[#allocation5 + $0x2e4] ss:$16 sps:$4 sm:$0xff]   ;;  %1325 = vmatprep.subr.bf16.mxu0 %v2457_v0  ;;  %v2462_v3 = vld [vmem:[#allocation5 + $0x2e0] ss:$16 sps:$4 sm:$0xff]   ;;  %vm1321_vm0 = vcmask 130048   ;;  %vm2930_vm1 = vmmov 0  }
  0x41   :  { %1366 = vmatprep.subr.bf16.mxu1 %v2459_v1  ;;  %v2463_v4 = vld [vmem:[#allocation5 + $0xc4] ss:$16 sps:$4 sm:$0xff]   ;;  %1326 = vmatpush1.bf16.msra.mxu0 %v2461_v2  ;;  %v2467_v6 = vld [vmem:[#allocation5 + $0xc0] ss:$16 sps:$4 sm:$0xff]  }
  0x42   :  { %1367 = vmatpush1.bf16.msra.mxu1 %v2462_v3  ;;  %v2465_v5 = vld [vmem:[#allocation5 + $0x2c4] ss:$16 sps:$4 sm:$0xff]   ;;  %1327 = vmatprep.subr.bf16.mxu0 %v2463_v4  ;;  %v2468_v7 = vld [vmem:[#allocation5 + $0x2c0] ss:$16 sps:$4 sm:$0xff]   ;;  %v92_v4 = vld [vmem:[#allocation2] sm:$0xff] }
  0x43   :  { %1368 = vmatprep.subr.bf16.mxu1 %v2465_v5  ;;  %v2469_v8 = vld [vmem:[#allocation5 + $0xa4] ss:$16 sps:$4 sm:$0xff]   ;;  %v2473_v10 = vld [vmem:[#allocation5 + $0xa0] ss:$16 sps:$4 sm:$0xff]   ;;  %v94_v5 = vld [vmem:[#allocation2 + $0x10] sm:$0xff] }
  0x44   :  { %v2471_v9 = vld [vmem:[#allocation5 + $0x2a4] ss:$16 sps:$4 sm:$0xff]   ;;  %v2474_v11 = vld [vmem:[#allocation5 + $0x2a0] ss:$16 sps:$4 sm:$0xff]  }
  0x45   :  { %1328 = vmatpush1.bf16.msra.mxu0 %v2467_v6  ;;  %v2475_v12 = vld [vmem:[#allocation5 + $0x84] ss:$16 sps:$4 sm:$0xff]   ;;  %v2479_v14 = vld [vmem:[#allocation5 + $0x80] ss:$16 sps:$4 sm:$0xff]  }
  0x46   :  { %1369 = vmatpush1.bf16.msra.mxu1 %v2468_v7  ;;  %1329 = vmatprep.subr.bf16.mxu0 %v2469_v8  ;;  %v2477_v13 = vld [vmem:[#allocation5 + $0x284] ss:$16 sps:$4 sm:$0xff]   ;;  %v2480_v15 = vld [vmem:[#allocation5 + $0x280] ss:$16 sps:$4 sm:$0xff]   ;;  %v2999_v8 = vpack.c.bf16 %v92_v4, %v92_v4  ;;  %v2636_v4 = vld [vmem:[#allocation5 + $0x16c] ss:$16 sps:$4 sm:$0xff]  }
  0x47   :  { %1370 = vmatprep.subr.bf16.mxu1 %v2471_v9  ;;  %v2481_v16 = vld [vmem:[#allocation5 + $0x64] ss:$16 sps:$4 sm:$0xff]   ;;  %v2485_v18 = vld [vmem:[#allocation5 + $0x60] ss:$16 sps:$4 sm:$0xff]   ;;  %v3001_v9 = vpack.c.bf16 %v94_v5, %v94_v5 }
  0x48   :  { %v2483_v17 = vld [vmem:[#allocation5 + $0x264] ss:$16 sps:$4 sm:$0xff]   ;;  %v2486_v19 = vld [vmem:[#allocation5 + $0x260] ss:$16 sps:$4 sm:$0xff]  }
  0x49   :  { %1330 = vmatpush1.bf16.msra.mxu0 %v2473_v10  ;;  %v2487_v20 = vld [vmem:[#allocation5 + $0x44] ss:$16 sps:$4 sm:$0xff]   ;;  %v2491_v22 = vld [vmem:[#allocation5 + $0x40] ss:$16 sps:$4 sm:$0xff]  }
  0x4a   :  { %1371 = vmatpush1.bf16.msra.mxu1 %v2474_v11  ;;  %1331 = vmatprep.subr.bf16.mxu0 %v2475_v12  ;;  %v2489_v21 = vld [vmem:[#allocation5 + $0x244] ss:$16 sps:$4 sm:$0xff]   ;;  %v2492_v23 = vld [vmem:[#allocation5 + $0x240] ss:$16 sps:$4 sm:$0xff]  }
  0x4b   :  { %1372 = vmatprep.subr.bf16.mxu1 %v2477_v13  ;;  %v2493_v24 = vld [vmem:[#allocation5 + $0x24] ss:$16 sps:$4 sm:$0xff]   ;;  %v2497_v26 = vld [vmem:[#allocation5 + $0x20] ss:$16 sps:$4 sm:$0xff]   ;;  %v2564_v13 = vld [vmem:[#allocation5 + $0xec] ss:$16 sps:$4 sm:$0xff]  }
  0x4c   :  { %v2495_v25 = vld [vmem:[#allocation5 + $0x224] ss:$16 sps:$4 sm:$0xff]   ;;  %v2498_v27 = vld [vmem:[#allocation5 + $0x220] ss:$16 sps:$4 sm:$0xff]  }
  0x4d   :  { %1332 = vmatpush1.bf16.msra.mxu0 %v2479_v14  ;;  %v2499_v28 = vld [vmem:[#allocation5 + $0x4] ss:$16 sps:$4 sm:$0xff]   ;;  %v2503_v30 = vld [vmem:[#allocation5] ss:$16 sps:$4 sm:$0xff]  }
  0x4e   :  { %1373 = vmatpush1.bf16.msra.mxu1 %v2480_v15  ;;  %1333 = vmatprep.subr.bf16.mxu0 %v2481_v16  ;;  %v2501_v29 = vld [vmem:[#allocation5 + $0x204] ss:$16 sps:$4 sm:$0xff]   ;;  %v2504_v31 = vld [vmem:[#allocation5 + $0x200] ss:$16 sps:$4 sm:$0xff]   ;;  %v98_v15 = vld [vmem:[#allocation2 + $0x30] sm:$0xff]  ;;  %v2928_v16 = vmov 0  }
  0x4f   :  { %1374 = vmatprep.subr.bf16.mxu1 %v2483_v17  ;;  %v2505_v32 = vld [vmem:[#allocation5 + $0x1e4] ss:$16 sps:$4 sm:$0xff]   ;;  %v2509_v34 = vld [vmem:[#allocation5 + $0x1e0] ss:$16 sps:$4 sm:$0xff]  }
  0x50   :  { %v2507_v33 = vld [vmem:[#allocation5 + $0x3e4] ss:$16 sps:$4 sm:$0xff]   ;;  %v2510_v35 = vld [vmem:[#allocation5 + $0x3e0] ss:$16 sps:$4 sm:$0xff]  }
  0x51   :  { %1334 = vmatpush1.bf16.msra.mxu0 %v2485_v18  ;;  %v2511_v36 = vld [vmem:[#allocation5 + $0x1c4] ss:$16 sps:$4 sm:$0xff]   ;;  %v2515_v38 = vld [vmem:[#allocation5 + $0x1c0] ss:$16 sps:$4 sm:$0xff]   ;;  %v2562_v18 = vld [vmem:[#allocation5 + $0xe8] ss:$16 sps:$4 sm:$0xff]  }
  0x52   :  { %1375 = vmatpush1.bf16.msra.mxu1 %v2486_v19  ;;  %1335 = vmatprep.subr.bf16.mxu0 %v2487_v20  ;;  %v2513_v37 = vld [vmem:[#allocation5 + $0x3c4] ss:$16 sps:$4 sm:$0xff]   ;;  %v2516_v39 = vld [vmem:[#allocation5 + $0x3c0] ss:$16 sps:$4 sm:$0xff]   ;;  %v3006_v19 = vpack.c.bf16 %v98_v15, %v98_v15  ;;  %v96_v15 = vld [vmem:[#allocation2 + $0x20] sm:$0xff] }
  0x53   :  { %1376 = vmatprep.subr.bf16.mxu1 %v2489_v21  ;;  %v2517_v40 = vld [vmem:[#allocation5 + $0x1a4] ss:$16 sps:$4 sm:$0xff]   ;;  %v2521_v42 = vld [vmem:[#allocation5 + $0x1a0] ss:$16 sps:$4 sm:$0xff]   ;;  %v2570_v21 = vld [vmem:[#allocation5 + $0xcc] ss:$16 sps:$4 sm:$0xff]  }
  0x54   :  { %v2519_v41 = vld [vmem:[#allocation5 + $0x3a4] ss:$16 sps:$4 sm:$0xff]   ;;  %v2522_v43 = vld [vmem:[#allocation5 + $0x3a0] ss:$16 sps:$4 sm:$0xff]  }
  0x55   :  { %1336 = vmatpush1.bf16.msra.mxu0 %v2491_v22  ;;  %v2523_v44 = vld [vmem:[#allocation5 + $0x184] ss:$16 sps:$4 sm:$0xff]   ;;  %v2527_v47 = vld [vmem:[#allocation5 + $0x180] ss:$16 sps:$4 sm:$0xff]  }
  0x56   :  { %1377 = vmatpush1.bf16.msra.mxu1 %v2492_v23  ;;  %1337 = vmatprep.subr.bf16.mxu0 %v2493_v24  ;;  %v2525_v45 = vld [vmem:[#allocation5 + $0x384] ss:$16 sps:$4 sm:$0xff]   ;;  %v2528_v48 = vld [vmem:[#allocation5 + $0x380] ss:$16 sps:$4 sm:$0xff]   ;;  %v2568_v23 = vld [vmem:[#allocation5 + $0xc8] ss:$16 sps:$4 sm:$0xff]  }
  0x57   :  { %1378 = vmatprep.subr.bf16.mxu1 %v2495_v25  ;;  %v93_v46 = vld [vmem:[#allocation2 + $0x8] sm:$0xff]  ;;  %v95_v50 = vld [vmem:[#allocation2 + $0x18] sm:$0xff]  ;;  %v2576_v25 = vld [vmem:[#allocation5 + $0xac] ss:$16 sps:$4 sm:$0xff]  }
  0x58   :  { %v2993_v49 = vpack.c.bf16 %v93_v46, %v93_v46  ;;  %v2529_v51 = vld [vmem:[#allocation5 + $0x164] ss:$16 sps:$4 sm:$0xff]   ;;  %v2995_v52 = vpack.c.bf16 %v95_v50, %v95_v50  ;;  %v2533_v54 = vld [vmem:[#allocation5 + $0x160] ss:$16 sps:$4 sm:$0xff]  }
  0x59   :  { %1338 = vmatpush1.bf16.msra.mxu0 %v2497_v26  ;;  %v2531_v53 = vld [vmem:[#allocation5 + $0x364] ss:$16 sps:$4 sm:$0xff]   ;;  %v2534_v55 = vld [vmem:[#allocation5 + $0x360] ss:$16 sps:$4 sm:$0xff]  }
  0x5a   :  { %1379 = vmatpush1.bf16.msra.mxu1 %v2498_v27  ;;  %1339 = vmatprep.subr.bf16.mxu0 %v2499_v28  ;;  %v2535_v56 = vld [vmem:[#allocation5 + $0x144] ss:$16 sps:$4 sm:$0xff]   ;;  %v2539_v58 = vld [vmem:[#allocation5 + $0x140] ss:$16 sps:$4 sm:$0xff]   ;;  %v2574_v27 = vld [vmem:[#allocation5 + $0xa8] ss:$16 sps:$4 sm:$0xff]  }
  0x5b   :  { %1380 = vmatprep.subr.bf16.mxu1 %v2501_v29  ;;  %1357 = vmatprep.mubr.bf16.mxu0 %v2993_v49  ;;  %v2537_v57 = vld [vmem:[#allocation5 + $0x344] ss:$16 sps:$4 sm:$0xff]   ;;  %v2540_v59 = vld [vmem:[#allocation5 + $0x340] ss:$16 sps:$4 sm:$0xff]   ;;  %v2582_v29 = vld [vmem:[#allocation5 + $0x8c] ss:$16 sps:$4 sm:$0xff]  }
  0x5c   :  { %1398 = vmatprep.mubr.bf16.mxu1 %v2995_v52  ;;  %v2541_v60 = vld [vmem:[#allocation5 + $0x124] ss:$16 sps:$4 sm:$0xff]   ;;  %v2545_v62 = vld [vmem:[#allocation5 + $0x120] ss:$16 sps:$4 sm:$0xff]  }
  0x5d   :  { %1340 = vmatpush1.bf16.msra.mxu0 %v2503_v30  ;;  %v2543_v61 = vld [vmem:[#allocation5 + $0x324] ss:$16 sps:$4 sm:$0xff]   ;;  %v2546_v63 = vld [vmem:[#allocation5 + $0x320] ss:$16 sps:$4 sm:$0xff]  }
  0x5e   :  { %1381 = vmatpush1.bf16.msra.mxu1 %v2504_v31  ;;  %1341 = vmatprep.subr.bf16.mxu0 %v2505_v32  ;;  %v2547_v0 = vld [vmem:[#allocation5 + $0x104] ss:$16 sps:$4 sm:$0xff]   ;;  %v2551_v2 = vld [vmem:[#allocation5 + $0x100] ss:$16 sps:$4 sm:$0xff]   ;;  %v2580_v31 = vld [vmem:[#allocation5 + $0x88] ss:$16 sps:$4 sm:$0xff]  }
  0x5f   :  { %1382 = vmatprep.subr.bf16.mxu1 %v2507_v33  ;;  %v2549_v1 = vld [vmem:[#allocation5 + $0x304] ss:$16 sps:$4 sm:$0xff]   ;;  %v2552_v3 = vld [vmem:[#allocation5 + $0x300] ss:$16 sps:$4 sm:$0xff]   ;;  %v2588_v33 = vld [vmem:[#allocation5 + $0x6c] ss:$16 sps:$4 sm:$0xff]  }
  0x60   :  { %v2555_v6 = vld [vmem:[#allocation5 + $0x4e4] ss:$16 sps:$4 sm:$0xff]   ;;  %v2553_v10 = vld [vmem:[#allocation5 + $0x4e0] ss:$16 sps:$4 sm:$0xff]  }
  0x61   :  { %1342 = vmatpush2.bf16.msra.mxu0 %v2509_v34  ;;  %v2558_v7 = vld [vmem:[#allocation5 + $0x604] ss:$16 sps:$4 sm:$0xff]   ;;  %v2556_v11 = vld [vmem:[#allocation5 + $0x600] ss:$16 sps:$4 sm:$0xff]  }
  0x62   :  { %1383 = vmatpush2.bf16.msra.mxu1 %v2510_v35  ;;  %1343 = vmatprep.subr.bf16.mxu0 %v2511_v36  ;;  %v2561_v12 = vld [vmem:[#allocation5 + $0x4c4] ss:$16 sps:$4 sm:$0xff]   ;;  %v2559_v14 = vld [vmem:[#allocation5 + $0x4c0] ss:$16 sps:$4 sm:$0xff]  }
  0x63   :  { %1384 = vmatprep.subr.bf16.mxu1 %v2513_v37  ;;  %v2567_v17 = vld [vmem:[#allocation5 + $0x4a4] ss:$16 sps:$4 sm:$0xff]   ;;  %v2565_v20 = vld [vmem:[#allocation5 + $0x4a0] ss:$16 sps:$4 sm:$0xff]   ;;  %v2586_v37 = vld [vmem:[#allocation5 + $0x68] ss:$16 sps:$4 sm:$0xff]  }
  0x64   :  { %v2573_v22 = vld [vmem:[#allocation5 + $0x484] ss:$16 sps:$4 sm:$0xff]   ;;  %v2571_v24 = vld [vmem:[#allocation5 + $0x480] ss:$16 sps:$4 sm:$0xff]  }
  0x65   :  { %1344 = vmatpush2.bf16.msra.mxu0 %v2515_v38  ;;  %v2579_v26 = vld [vmem:[#allocation5 + $0x464] ss:$16 sps:$4 sm:$0xff]   ;;  %v2577_v28 = vld [vmem:[#allocation5 + $0x460] ss:$16 sps:$4 sm:$0xff]  }
  0x66   :  { %1385 = vmatpush2.bf16.msra.mxu1 %v2516_v39  ;;  %1345 = vmatprep.subr.bf16.mxu0 %v2517_v40  ;;  %v2585_v30 = vld [vmem:[#allocation5 + $0x444] ss:$16 sps:$4 sm:$0xff]   ;;  %v2583_v32 = vld [vmem:[#allocation5 + $0x440] ss:$16 sps:$4 sm:$0xff]   ;;  %v2594_v39 = vld [vmem:[#allocation5 + $0x4c] ss:$16 sps:$4 sm:$0xff]  }
  0x67   :  { %1386 = vmatprep.subr.bf16.mxu1 %v2519_v41  ;;  %v2591_v34 = vld [vmem:[#allocation5 + $0x424] ss:$16 sps:$4 sm:$0xff]   ;;  %v2589_v38 = vld [vmem:[#allocation5 + $0x420] ss:$16 sps:$4 sm:$0xff]   ;;  %v2592_v41 = vld [vmem:[#allocation5 + $0x48] ss:$16 sps:$4 sm:$0xff]  }
  0x68   :  { %v97_v35 = vld [vmem:[#allocation2 + $0x28] sm:$0xff] }
  0x69   :  { %1346 = vmatpush2.bf16.msra.mxu0 %v2521_v42  ;;  %v3011_v36 = vpack.c.bf16 %v97_v35, %v97_v35  ;;  %v2597_v40 = vld [vmem:[#allocation5 + $0x404] ss:$16 sps:$4 sm:$0xff]   ;;  %v2595_v42 = vld [vmem:[#allocation5 + $0x400] ss:$16 sps:$4 sm:$0xff]   ;;  %v2675_v35 = vld [vmem:[#allocation5 + $0x26c] ss:$16 sps:$4 sm:$0xff]  }
  0x6a   :  { %1387 = vmatpush2.bf16.msra.mxu1 %v2522_v43  ;;  %1347 = vmatprep.subr.bf16.mxu0 %v2523_v44  ;;  %v2600_v43 = vld [vmem:[#allocation5 + $0x2c] ss:$16 sps:$4 sm:$0xff]   ;;  %v2603_v44 = vld [vmem:[#allocation5 + $0x5e4] ss:$16 sps:$4 sm:$0xff]   ;;  %v2601_v46 = vld [vmem:[#allocation5 + $0x5e0] ss:$16 sps:$4 sm:$0xff]  }
  0x6b   :  { %1388 = vmatprep.subr.bf16.mxu1 %v2525_v45  ;;  %v2598_v45 = vld [vmem:[#allocation5 + $0x28] ss:$16 sps:$4 sm:$0xff]   ;;  %v2607_v50 = vld [vmem:[#allocation5 + $0x5c0] ss:$16 sps:$4 sm:$0xff]   ;;  %v2639_v5 = vld [vmem:[#allocation5 + $0x524] ss:$16 sps:$4 sm:$0xff]  }
  0x6d   :  { %1348 = vmatpush2.bf16.msra.mxu0 %v2527_v47  ;;  %v2606_v47 = vld [vmem:[#allocation5 + $0xc] ss:$16 sps:$4 sm:$0xff]  }
  0x6e   :  { %1389 = vmatpush2.bf16.msra.mxu1 %v2528_v48  ;;  %1349 = vmatprep.subr.bf16.mxu0 %v2529_v51  ;;  %v2609_v48 = vld [vmem:[#allocation5 + $0x5c4] ss:$16 sps:$4 sm:$0xff]   ;;  %v2612_v51 = vld [vmem:[#allocation5 + $0x1ec] ss:$16 sps:$4 sm:$0xff]  }
  0x6f   :  { %1390 = vmatprep.subr.bf16.mxu1 %v2531_v53  ;;  %v2615_v53 = vld [vmem:[#allocation5 + $0x5a4] ss:$16 sps:$4 sm:$0xff]  }
  0x71   :  { %1350 = vmatpush2.bf16.msra.mxu0 %v2533_v54  ;;  %v2610_v54 = vld [vmem:[#allocation5 + $0x1e8] ss:$16 sps:$4 sm:$0xff]  }
  0x72   :  { %1391 = vmatpush2.bf16.msra.mxu1 %v2534_v55  ;;  %1351 = vmatprep.subr.bf16.mxu0 %v2535_v56  ;;  %v2613_v55 = vld [vmem:[#allocation5 + $0x5a0] ss:$16 sps:$4 sm:$0xff]   ;;  %v2618_v56 = vld [vmem:[#allocation5 + $0x1cc] ss:$16 sps:$4 sm:$0xff]  }
  0x73   :  { %1392 = vmatprep.subr.bf16.mxu1 %v2537_v57  ;;  %v2621_v57 = vld [vmem:[#allocation5 + $0x584] ss:$16 sps:$4 sm:$0xff]  }
  0x75   :  { %1352 = vmatpush2.bf16.msra.mxu0 %v2539_v58  ;;  %v2616_v58 = vld [vmem:[#allocation5 + $0x1c8] ss:$16 sps:$4 sm:$0xff]  }
  0x76   :  { %1393 = vmatpush2.bf16.msra.mxu1 %v2540_v59  ;;  %1353 = vmatprep.subr.bf16.mxu0 %v2541_v60  ;;  %v2619_v59 = vld [vmem:[#allocation5 + $0x580] ss:$16 sps:$4 sm:$0xff]   ;;  %v2624_v60 = vld [vmem:[#allocation5 + $0x1ac] ss:$16 sps:$4 sm:$0xff]  }
  0x77   :  { %1394 = vmatprep.subr.bf16.mxu1 %v2543_v61  ;;  %v2627_v61 = vld [vmem:[#allocation5 + $0x564] ss:$16 sps:$4 sm:$0xff]  }
  0x79   :  { %1354 = vmatpush2.bf16.msra.mxu0 %v2545_v62  ;;  %v2622_v62 = vld [vmem:[#allocation5 + $0x1a8] ss:$16 sps:$4 sm:$0xff]  }
  0x7a   :  { %1395 = vmatpush2.bf16.msra.mxu1 %v2546_v63  ;;  %1355 = vmatprep.subr.bf16.mxu0 %v2547_v0  ;;  %v2625_v63 = vld [vmem:[#allocation5 + $0x560] ss:$16 sps:$4 sm:$0xff]   ;;  %v2630_v0 = vld [vmem:[#allocation5 + $0x18c] ss:$16 sps:$4 sm:$0xff]  }
  0x7b   :  { %1396 = vmatprep.subr.bf16.mxu1 %v2549_v1  ;;  %v2633_v1 = vld [vmem:[#allocation5 + $0x544] ss:$16 sps:$4 sm:$0xff]  }
  0x7d   :  { %1356 = vmatpush2.bf16.msra.mxu0 %v2551_v2  ;;  %v2628_v2 = vld [vmem:[#allocation5 + $0x188] ss:$16 sps:$4 sm:$0xff]  }
  0x7e   :  { %1397 = vmatpush2.bf16.msra.mxu1 %v2552_v3  ;;  %1407 = vmatprep.subr.bf16.mxu0 %v2555_v6  ;;  %v2631_v3 = vld [vmem:[#allocation5 + $0x540] ss:$16 sps:$4 sm:$0xff]   ;;  %v2634_v6 = vld [vmem:[#allocation5 + $0x168] ss:$16 sps:$4 sm:$0xff]  }
  0x7f   :  { %1462 = vmatprep.subr.bf16.mxu1 %v2558_v7  ;;  %v2637_v7 = vld [vmem:[#allocation5 + $0x520] ss:$16 sps:$4 sm:$0xff]  }
  0x80   :  { %1358 = vmatmul.mubr.bf16.vlgmr.msra.gmra.mxu0 %v2999_v8 }
  0x81   :  { %1399 = vmatmul.mubr.bf16.vlgmr.msra.gmra.mxu1 %v3001_v9  ;;  %1408 = vmatpush1.bf16.msra.mxu0 %v2553_v10  ;;  %v2642_v10 = vld [vmem:[#allocation5 + $0x14c] ss:$16 sps:$4 sm:$0xff]  }
  0x82   :  { %1463 = vmatpush1.bf16.msra.mxu1 %v2556_v11  ;;  %1409 = vmatprep.subr.bf16.mxu0 %v2561_v12  ;;  %v2645_v11 = vld [vmem:[#allocation5 + $0x504] ss:$16 sps:$4 sm:$0xff]   ;;  %v2640_v12 = vld [vmem:[#allocation5 + $0x148] ss:$16 sps:$4 sm:$0xff]  }
  0x83   :  { %1480 = vmatprep.mubr.bf16.mxu1 %v2928_v16  ;;  %1489 = vmatprep.subr.bf16.mxu1 %v2564_v13  ;;  %v2643_v13 = vld [vmem:[#allocation5 + $0x500] ss:$16 sps:$4 sm:$0xff]  }
  0x84   :  { %1439 = vmatprep.mubr.bf16.mxu0 %v3011_v36 }
  0x85   :  { %1410 = vmatpush1.bf16.msra.mxu0 %v2559_v14  ;;  %v2648_v14 = vld [vmem:[#allocation5 + $0x12c] ss:$16 sps:$4 sm:$0xff]  }
  0x86   :  { %1411 = vmatprep.subr.bf16.mxu0 %v2567_v17  ;;  %v2651_v17 = vld [vmem:[#allocation5 + $0x2ec] ss:$16 sps:$4 sm:$0xff]  }
  0x89   :  { %2329 = vmatmul.mubr.msk.bf16.vlgmr.msra.gmra.mxu1 %vm1321_vm0, %v3006_v19  ;;  %1412 = vmatpush1.bf16.msra.mxu0 %v2565_v20  ;;  %v3014_v20 = vpack.c.bf16 %v96_v15, %v96_v15  ;;  %v2738_v15 = vld [vmem:[#allocation5 + $0x54c] ss:$16 sps:$4 sm:$0xff]  }
  0x8a   :  { %1490 = vmatpush1.bf16.msra.mxu1 %v2562_v18  ;;  %1413 = vmatprep.subr.bf16.mxu0 %v2573_v22  ;;  %v2646_v18 = vld [vmem:[#allocation5 + $0x128] ss:$16 sps:$4 sm:$0xff]   ;;  %v2654_v22 = vld [vmem:[#allocation5 + $0x10c] ss:$16 sps:$4 sm:$0xff]  }
  0x8b   :  { %1491 = vmatprep.subr.bf16.mxu1 %v2570_v21  ;;  %1521 = vmatprep.mubr.bf16.mxu1 %v2993_v49  ;;  %v2604_v49 = vld [vmem:[#allocation5 + $0x8] ss:$16 sps:$4 sm:$0xff]  }
  0x8c   :  { %v2649_v21 = vld [vmem:[#allocation5 + $0x2e8] ss:$16 sps:$4 sm:$0xff]  }
  0x8d   :  { %1414 = vmatpush1.bf16.msra.mxu0 %v2571_v24  ;;  %v2652_v24 = vld [vmem:[#allocation5 + $0x108] ss:$16 sps:$4 sm:$0xff]  }
  0x8e   :  { %1492 = vmatpush1.bf16.msra.mxu1 %v2568_v23  ;;  %1415 = vmatprep.subr.bf16.mxu0 %v2579_v26  ;;  %v2657_v23 = vld [vmem:[#allocation5 + $0x2cc] ss:$16 sps:$4 sm:$0xff]  }
  0x8f   :  { %1493 = vmatprep.subr.bf16.mxu1 %v2576_v25  ;;  %v2655_v25 = vld [vmem:[#allocation5 + $0x2c8] ss:$16 sps:$4 sm:$0xff]   ;;  %v2660_v26 = vld [vmem:[#allocation5 + $0x4ec] ss:$16 sps:$4 sm:$0xff]  }
  0x91   :  { %1416 = vmatpush1.bf16.msra.mxu0 %v2577_v28  ;;  %v2658_v28 = vld [vmem:[#allocation5 + $0x4e8] ss:$16 sps:$4 sm:$0xff]  }
  0x92   :  { %1494 = vmatpush1.bf16.msra.mxu1 %v2574_v27  ;;  %1417 = vmatprep.subr.bf16.mxu0 %v2585_v30  ;;  %v2663_v27 = vld [vmem:[#allocation5 + $0x2ac] ss:$16 sps:$4 sm:$0xff]  }
  0x93   :  { %1495 = vmatprep.subr.bf16.mxu1 %v2582_v29  ;;  %v2661_v29 = vld [vmem:[#allocation5 + $0x2a8] ss:$16 sps:$4 sm:$0xff]   ;;  %v2666_v30 = vld [vmem:[#allocation5 + $0x4cc] ss:$16 sps:$4 sm:$0xff]  }
  0x95   :  { %1418 = vmatpush1.bf16.msra.mxu0 %v2583_v32  ;;  %v2664_v32 = vld [vmem:[#allocation5 + $0x4c8] ss:$16 sps:$4 sm:$0xff]  }
  0x96   :  { %1496 = vmatpush1.bf16.msra.mxu1 %v2580_v31  ;;  %1419 = vmatprep.subr.bf16.mxu0 %v2591_v34  ;;  %v2669_v31 = vld [vmem:[#allocation5 + $0x28c] ss:$16 sps:$4 sm:$0xff]  }
  0x97   :  { %1497 = vmatprep.subr.bf16.mxu1 %v2588_v33  ;;  %v2667_v33 = vld [vmem:[#allocation5 + $0x288] ss:$16 sps:$4 sm:$0xff]   ;;  %v2672_v34 = vld [vmem:[#allocation5 + $0x4ac] ss:$16 sps:$4 sm:$0xff]  }
  0x99   :  { %1420 = vmatpush1.bf16.msra.mxu0 %v2589_v38  ;;  %v2673_v38 = vld [vmem:[#allocation5 + $0x268] ss:$16 sps:$4 sm:$0xff]  }
  0x9a   :  { %1498 = vmatpush1.bf16.msra.mxu1 %v2586_v37  ;;  %1421 = vmatprep.subr.bf16.mxu0 %v2597_v40  ;;  %v2670_v37 = vld [vmem:[#allocation5 + $0x4a8] ss:$16 sps:$4 sm:$0xff]  }
  0x9b   :  { %1499 = vmatprep.subr.bf16.mxu1 %v2594_v39  ;;  %v2681_v39 = vld [vmem:[#allocation5 + $0x24c] ss:$16 sps:$4 sm:$0xff]   ;;  %v2676_v40 = vld [vmem:[#allocation5 + $0x488] ss:$16 sps:$4 sm:$0xff]  }
  0x9d   :  { %1422 = vmatpush1.bf16.msra.mxu0 %v2595_v42  ;;  %v2684_v42 = vld [vmem:[#allocation5 + $0x46c] ss:$16 sps:$4 sm:$0xff]  }
  0x9e   :  { %1500 = vmatpush1.bf16.msra.mxu1 %v2592_v41  ;;  %1423 = vmatprep.subr.bf16.mxu0 %v2603_v44  ;;  %v2679_v41 = vld [vmem:[#allocation5 + $0x248] ss:$16 sps:$4 sm:$0xff]  }
  0x9f   :  { %1501 = vmatprep.subr.bf16.mxu1 %v2600_v43  ;;  %v2682_v43 = vld [vmem:[#allocation5 + $0x468] ss:$16 sps:$4 sm:$0xff]  }
  0xa0   :  { %v2685_v44 = vld [vmem:[#allocation5 + $0x228] ss:$16 sps:$4 sm:$0xff]  }
  0xa1   :  { %1424 = vmatpush2.bf16.msra.mxu0 %v2601_v46  ;;  %v2693_v46 = vld [vmem:[#allocation5 + $0x20c] ss:$16 sps:$4 sm:$0xff]  }
  0xa2   :  { %1502 = vmatpush1.bf16.msra.mxu1 %v2598_v45  ;;  %1425 = vmatprep.subr.bf16.mxu0 %v2609_v48  ;;  %v2690_v45 = vld [vmem:[#allocation5 + $0x44c] ss:$16 sps:$4 sm:$0xff]  }
  0xa3   :  { %1503 = vmatprep.subr.bf16.mxu1 %v2606_v47  ;;  %v2691_v47 = vld [vmem:[#allocation5 + $0x208] ss:$16 sps:$4 sm:$0xff]   ;;  %v2696_v48 = vld [vmem:[#allocation5 + $0x42c] ss:$16 sps:$4 sm:$0xff]  }
  0xa5   :  { %1426 = vmatpush2.bf16.msra.mxu0 %v2607_v50  ;;  %v2694_v50 = vld [vmem:[#allocation5 + $0x428] ss:$16 sps:$4 sm:$0xff]  }
  0xa6   :  { %1504 = vmatpush1.bf16.msra.mxu1 %v2604_v49  ;;  %1427 = vmatprep.subr.bf16.mxu0 %v2615_v53  ;;  %v2699_v49 = vld [vmem:[#allocation5 + $0x3ec] ss:$16 sps:$4 sm:$0xff]  }
  0xa7   :  { %1505 = vmatprep.subr.bf16.mxu1 %v2612_v51  ;;  %v2697_v51 = vld [vmem:[#allocation5 + $0x3e8] ss:$16 sps:$4 sm:$0xff]   ;;  %v2702_v53 = vld [vmem:[#allocation5 + $0x40c] ss:$16 sps:$4 sm:$0xff]  }
  0xa9   :  { %1428 = vmatpush2.bf16.msra.mxu0 %v2613_v55  ;;  %v2700_v55 = vld [vmem:[#allocation5 + $0x408] ss:$16 sps:$4 sm:$0xff]  }
  0xaa   :  { %1506 = vmatpush2.bf16.msra.mxu1 %v2610_v54  ;;  %1429 = vmatprep.subr.bf16.mxu0 %v2621_v57  ;;  %v2705_v54 = vld [vmem:[#allocation5 + $0x3cc] ss:$16 sps:$4 sm:$0xff]  }
  0xab   :  { %1507 = vmatprep.subr.bf16.mxu1 %v2618_v56  ;;  %v2703_v56 = vld [vmem:[#allocation5 + $0x3c8] ss:$16 sps:$4 sm:$0xff]   ;;  %v2708_v57 = vld [vmem:[#allocation5 + $0x5ec] ss:$16 sps:$4 sm:$0xff]  }
  0xad   :  { %1430 = vmatpush2.bf16.msra.mxu0 %v2619_v59  ;;  %v2706_v59 = vld [vmem:[#allocation5 + $0x5e8] ss:$16 sps:$4 sm:$0xff]  }
  0xae   :  { %1508 = vmatpush2.bf16.msra.mxu1 %v2616_v58  ;;  %1431 = vmatprep.subr.bf16.mxu0 %v2627_v61  ;;  %v2711_v58 = vld [vmem:[#allocation5 + $0x3ac] ss:$16 sps:$4 sm:$0xff]  }
  0xaf   :  { %1509 = vmatprep.subr.bf16.mxu1 %v2624_v60  ;;  %v2709_v60 = vld [vmem:[#allocation5 + $0x3a8] ss:$16 sps:$4 sm:$0xff]   ;;  %v2714_v61 = vld [vmem:[#allocation5 + $0x5cc] ss:$16 sps:$4 sm:$0xff]  }
  0xb1   :  { %1432 = vmatpush2.bf16.msra.mxu0 %v2625_v63  ;;  %v2712_v63 = vld [vmem:[#allocation5 + $0x5c8] ss:$16 sps:$4 sm:$0xff]  }
  0xb2   :  { %1510 = vmatpush2.bf16.msra.mxu1 %v2622_v62  ;;  %1433 = vmatprep.subr.bf16.mxu0 %v2633_v1  ;;  %v2717_v62 = vld [vmem:[#allocation5 + $0x38c] ss:$16 sps:$4 sm:$0xff]  }
  0xb3   :  { %1511 = vmatprep.subr.bf16.mxu1 %v2630_v0  ;;  %v2715_v0 = vld [vmem:[#allocation5 + $0x388] ss:$16 sps:$4 sm:$0xff]   ;;  %v2720_v1 = vld [vmem:[#allocation5 + $0x5ac] ss:$16 sps:$4 sm:$0xff]  }
  0xb5   :  { %1434 = vmatpush2.bf16.msra.mxu0 %v2631_v3  ;;  %v2718_v3 = vld [vmem:[#allocation5 + $0x5a8] ss:$16 sps:$4 sm:$0xff]  }
  0xb6   :  { %1512 = vmatpush2.bf16.msra.mxu1 %v2628_v2  ;;  %1435 = vmatprep.subr.bf16.mxu0 %v2639_v5  ;;  %v2723_v2 = vld [vmem:[#allocation5 + $0x36c] ss:$16 sps:$4 sm:$0xff]  }
  0xb7   :  { %1513 = vmatprep.subr.bf16.mxu1 %v2636_v4  ;;  %v2721_v4 = vld [vmem:[#allocation5 + $0x368] ss:$16 sps:$4 sm:$0xff]   ;;  %v2726_v5 = vld [vmem:[#allocation5 + $0x58c] ss:$16 sps:$4 sm:$0xff]  }
  0xb9   :  { %1436 = vmatpush2.bf16.msra.mxu0 %v2637_v7  ;;  %v2724_v7 = vld [vmem:[#allocation5 + $0x588] ss:$16 sps:$4 sm:$0xff]  }
  0xba   :  { %1514 = vmatpush2.bf16.msra.mxu1 %v2634_v6  ;;  %1437 = vmatprep.subr.bf16.mxu0 %v2645_v11  ;;  %v2729_v6 = vld [vmem:[#allocation5 + $0x34c] ss:$16 sps:$4 sm:$0xff]  }
  0xbb   :  { %1515 = vmatprep.subr.bf16.mxu1 %v2642_v10  ;;  %v2727_v10 = vld [vmem:[#allocation5 + $0x348] ss:$16 sps:$4 sm:$0xff]   ;;  %v2732_v11 = vld [vmem:[#allocation5 + $0x56c] ss:$16 sps:$4 sm:$0xff]  }
  0xbd   :  { %1438 = vmatpush2.bf16.msra.mxu0 %v2643_v13  ;;  %v2730_v13 = vld [vmem:[#allocation5 + $0x568] ss:$16 sps:$4 sm:$0xff]  }
  0xbe   :  { %1516 = vmatpush2.bf16.msra.mxu1 %v2640_v12  ;;  %1530 = vmatprep.subr.bf16.mxu0 %v2651_v17  ;;  %v2735_v12 = vld [vmem:[#allocation5 + $0x32c] ss:$16 sps:$4 sm:$0xff]  }
  0xbf   :  { %1517 = vmatprep.subr.bf16.mxu1 %v2648_v14  ;;  %v2733_v14 = vld [vmem:[#allocation5 + $0x328] ss:$16 sps:$4 sm:$0xff]   ;;  %v2741_v17 = vld [vmem:[#allocation5 + $0x30c] ss:$16 sps:$4 sm:$0xff]  }
  0xc0   :  { %1440 = vmatmul.mubr.bf16.vlgmr.msra.gmra.mxu0 %v3014_v20 }
  0xc1   :  { %1531 = vmatpush1.bf16.msra.mxu0 %v2649_v21  ;;  %1562 = vmatprep.mubr.bf16.mxu0 %v2995_v52  ;;  %v2678_v52 = vld [vmem:[#allocation5 + $0x48c] ss:$16 sps:$4 sm:$0xff]   ;;  %v2739_v21 = vld [vmem:[#allocation5 + $0x308] ss:$16 sps:$4 sm:$0xff]  }
  0xc2   :  { %1518 = vmatpush2.bf16.msra.mxu1 %v2646_v18  ;;  %1532 = vmatprep.subr.bf16.mxu0 %v2657_v23  ;;  %v2736_v18 = vld [vmem:[#allocation5 + $0x548] ss:$16 sps:$4 sm:$0xff]   ;;  %v2751_v23 = vld [vmem:[#allocation8 + $0x78] sm:$0xff]  }
  0xc3   :  { %1519 = vmatprep.subr.bf16.mxu1 %v2654_v22  ;;  %v2744_v22 = vld [vmem:[#allocation5 + $0x52c] ss:$16 sps:$4 sm:$0xff]  }
  0xc5   :  { %1533 = vmatpush1.bf16.msra.mxu0 %v2655_v25  ;;  %v2752_v25 = vld [vmem:[#allocation8 + $0x38] sm:$0xff]  }
  0xc6   :  { %1520 = vmatpush2.bf16.msra.mxu1 %v2652_v24  ;;  %1534 = vmatprep.subr.bf16.mxu0 %v2663_v27  ;;  %v2742_v24 = vld [vmem:[#allocation5 + $0x528] ss:$16 sps:$4 sm:$0xff]  }
  0xc7   :  { %1571 = vmatprep.subr.bf16.mxu1 %v2660_v26  ;;  %v2747_v26 = vld [vmem:[#allocation5 + $0x50c] ss:$16 sps:$4 sm:$0xff]   ;;  %v2753_v27 = vld [vmem:[#allocation8 + $0x70] sm:$0xff]  }
  0xc9   :  { %1522 = vmatmul.mubr.bf16.vlgmr.msra.gmra.mxu1 %v2999_v8  ;;  %1535 = vmatpush1.bf16.msra.mxu0 %v2661_v29  ;;  %v2687_v8 = vld [vmem:[#allocation5 + $0x22c] ss:$16 sps:$4 sm:$0xff]   ;;  %v2754_v29 = vld [vmem:[#allocation8 + $0x30] sm:$0xff]  }
  0xca   :  { %1572 = vmatpush1.bf16.msra.mxu1 %v2658_v28  ;;  %1536 = vmatprep.subr.bf16.mxu0 %v2669_v31  ;;  %v2745_v28 = vld [vmem:[#allocation5 + $0x508] ss:$16 sps:$4 sm:$0xff]   ;;  %v2755_v31 = vld [vmem:[#allocation8 + $0x68] sm:$0xff]  }
  0xcb   :  { %1573 = vmatprep.subr.bf16.mxu1 %v2666_v30  ;;  %1603 = vmatprep.mubr.bf16.mxu1 %v3011_v36  ;;  %v2688_v36 = vld [vmem:[#allocation5 + $0x448] ss:$16 sps:$4 sm:$0xff]   ;;  %v2750_v30 = vld [vmem:[#allocation5 + $0x60c] ss:$16 sps:$4 sm:$0xff]  }
  0xcd   :  { %1537 = vmatpush1.bf16.msra.mxu0 %v2667_v33  ;;  %v2756_v33 = vld [vmem:[#allocation8 + $0x28] sm:$0xff]  }
  0xce   :  { %1574 = vmatpush1.bf16.msra.mxu1 %v2664_v32  ;;  %1538 = vmatprep.subr.bf16.mxu0 %v2675_v35  ;;  %v2748_v32 = vld [vmem:[#allocation5 + $0x608] ss:$16 sps:$4 sm:$0xff]   ;;  %v2759_v35 = vld [vmem:[#allocation8 + $0x58] sm:$0xff]  }
  0xcf   :  { %1575 = vmatprep.subr.bf16.mxu1 %v2672_v34  ;;  %v2757_v34 = vld [vmem:[#allocation8 + $0x60] sm:$0xff]  }
  0xd1   :  { %1539 = vmatpush1.bf16.msra.mxu0 %v2673_v38  ;;  %v2767_v38 = vld [vmem:[#allocation8 + $0xf8] sm:$0xff]  }
  0xd2   :  { %1576 = vmatpush1.bf16.msra.mxu1 %v2670_v37  ;;  %1540 = vmatprep.subr.bf16.mxu0 %v2681_v39  ;;  %v2760_v37 = vld [vmem:[#allocation8 + $0x18] sm:$0xff]   ;;  %v2769_v39 = vld [vmem:[#allocation8 + $0xf0] sm:$0xff]  }
  0xd3   :  { %1577 = vmatprep.subr.bf16.mxu1 %v2678_v52  ;;  %v2768_v52 = vld [vmem:[#allocation8 + $0xb8] sm:$0xff]  }
  0xd5   :  { %1541 = vmatpush1.bf16.msra.mxu0 %v2679_v41  ;;  %v2762_v41 = vld [vmem:[#allocation8 + $0x10] sm:$0xff]  }
  0xd6   :  { %1578 = vmatpush1.bf16.msra.mxu1 %v2676_v40  ;;  %1542 = vmatprep.subr.bf16.mxu0 %v2687_v8  ;;  %v2761_v40 = vld [vmem:[#allocation8 + $0x50] sm:$0xff]   ;;  %v2765_v8 = vld [vmem:[#allocation8 + $0x40] sm:$0xff]  }
  0xd7   :  { %1579 = vmatprep.subr.bf16.mxu1 %v2684_v42  ;;  %v2764_v42 = vld [vmem:[#allocation8 + $0x8] sm:$0xff]  }
  0xd9   :  { %1543 = vmatpush1.bf16.msra.mxu0 %v2685_v44 }
  0xda   :  { %1580 = vmatpush1.bf16.msra.mxu1 %v2682_v43  ;;  %1544 = vmatprep.subr.bf16.mxu0 %v2693_v46  ;;  %v2766_v43 = vld [vmem:[#allocation8] sm:$0xff]   ;;  %v2772_v46 = vld [vmem:[#allocation8 + $0xa8] sm:$0xff]  }
  0xdb   :  { %1581 = vmatprep.subr.bf16.mxu1 %v2690_v45 }
  0xdd   :  { %1545 = vmatpush1.bf16.msra.mxu0 %v2691_v47 }
  0xde   :  { %1582 = vmatpush1.bf16.msra.mxu1 %v2688_v36  ;;  %1546 = vmatprep.subr.bf16.mxu0 %v2699_v49  ;;  %v2774_v49 = vld [vmem:[#allocation8 + $0xa0] sm:$0xff]  }
  0xdf   :  { %1583 = vmatprep.subr.bf16.mxu1 %v2696_v48  ;;  %v2773_v48 = vld [vmem:[#allocation8 + $0xe0] sm:$0xff]  }
  0xe1   :  { %1547 = vmatpush2.bf16.msra.mxu0 %v2697_v51 }
  0xe2   :  { %1584 = vmatpush1.bf16.msra.mxu1 %v2694_v50  ;;  %1548 = vmatprep.subr.bf16.mxu0 %v2705_v54 }
  0xe3   :  { %1585 = vmatprep.subr.bf16.mxu1 %v2702_v53 }
  0xe5   :  { %1549 = vmatpush2.bf16.msra.mxu0 %v2703_v56  ;;  %v2775_v56 = vld [vmem:[#allocation8 + $0xd8] sm:$0xff]  }
  0xe6   :  { %1586 = vmatpush1.bf16.msra.mxu1 %v2700_v55  ;;  %1550 = vmatprep.subr.bf16.mxu0 %v2711_v58 }
  0xe7   :  { %1587 = vmatprep.subr.bf16.mxu1 %v2708_v57  ;;  %v2776_v57 = vld [vmem:[#allocation8 + $0x98] sm:$0xff]  }
  0xe9   :  { %1551 = vmatpush2.bf16.msra.mxu0 %v2709_v60  ;;  %v2777_v60 = vld [vmem:[#allocation8 + $0xd0] sm:$0xff]  }
  0xea   :  { %1588 = vmatpush2.bf16.msra.mxu1 %v2706_v59  ;;  %1552 = vmatprep.subr.bf16.mxu0 %v2717_v62 }
  0xeb   :  { %1589 = vmatprep.subr.bf16.mxu1 %v2714_v61  ;;  %v2778_v61 = vld [vmem:[#allocation8 + $0x90] sm:$0xff]  }
  0xed   :  { %1553 = vmatpush2.bf16.msra.mxu0 %v2715_v0  ;;  %v2780_v0 = vld [vmem:[#allocation8 + $0x88] sm:$0xff]  }
  0xee   :  { %1590 = vmatpush2.bf16.msra.mxu1 %v2712_v63  ;;  %1554 = vmatprep.subr.bf16.mxu0 %v2723_v2  ;;  %v2779_v63 = vld [vmem:[#allocation8 + $0xc8] sm:$0xff]   ;;  %v2782_v2 = vld [vmem:[#allocation8 + $0x80] sm:$0xff]  }
  0xef   :  { %1591 = vmatprep.subr.bf16.mxu1 %v2720_v1  ;;  %v2781_v1 = vld [vmem:[#allocation8 + $0xc0] sm:$0xff]  }
  0xf1   :  { %1555 = vmatpush2.bf16.msra.mxu0 %v2721_v4 }
  0xf2   :  { %1592 = vmatpush2.bf16.msra.mxu1 %v2718_v3  ;;  %1556 = vmatprep.subr.bf16.mxu0 %v2729_v6  ;;  %v305_v3 = vlaneseq }
  0xf3   :  { %1593 = vmatprep.subr.bf16.mxu1 %v2726_v5  ;;  %v302_v5 = vld [vmem:[#allocation7] sm:$0xf] }
  0xf4   :  { %v306_v4 = vshrl.u32 %v305_v3, 7  ;;  %v303_v6 = vunpack.c.l.bf16 %v302_v5  ;;  %v2786_v3 = vld [vmem:[#allocation10 + $0x20] sm:$0xff]   ;;  %v2788_v5 = vld [vmem:[#allocation10 + $0x10] sm:$0xff]  }
  0xf5   :  { %1557 = vmatpush2.bf16.msra.mxu0 %v2727_v10 }
  0xf6   :  { %1594 = vmatpush2.bf16.msra.mxu1 %v2724_v7  ;;  %1558 = vmatprep.subr.bf16.mxu0 %v2735_v12  ;;  %v3025_v7 = vsub.s32 0, %v306_v4  ;;  %v311_v10 = vsub.s32 2, %v306_v4 }
  0xf7   :  { %1595 = vmatprep.subr.bf16.mxu1 %v2732_v11 }
  0xf8   :  { %v308_v11 = vrot.slane %v303_v6, %v3025_v7  ;;  %v312_v12 = vrot.slane %v303_v6, %v311_v10  ;;  %v2790_v10 = vld [vmem:[#allocation10] sm:$0xff]  }
  0xf9   :  { %1559 = vmatpush2.bf16.msra.mxu0 %v2733_v14 }
  0xfa   :  { %1596 = vmatpush2.bf16.msra.mxu1 %v2730_v13  ;;  %1560 = vmatprep.subr.bf16.mxu0 %v2741_v17  ;;  %v328_v13 = vrot.slane %v308_v11, %v3025_v7  ;;  %v332_v14 = vrot.slane %v312_v12, %v3025_v7 }
  0xfb   :  { %1597 = vmatprep.subr.bf16.mxu1 %v2738_v15 }
  0xfd   :  { %1561 = vmatpush2.bf16.msra.mxu0 %v2739_v21 }
  0xfe   :  { %1598 = vmatpush2.bf16.msra.mxu1 %v2736_v18  ;;  %2371 = vmatprep.subr.bf16.mxu0 %v2751_v23 }
  0xff   :  { %1599 = vmatprep.subr.bf16.mxu1 %v2744_v22 }
 0x100   :  { %1563 = vmatmul.mubr.bf16.vlgmr.msra.gmra.mxu0 %v3001_v9  ;;  %v2758_v9 = vld [vmem:[#allocation8 + $0x20] sm:$0xff]  }
 0x101   :  { %2372 = vmatpush3.bf16.msra.mxu0 %v2752_v25 }
 0x102   :  { %1600 = vmatpush2.bf16.msra.mxu1 %v2742_v24  ;;  %2373 = vmatprep.subr.bf16.mxu0 %v2753_v27 }
 0x103   :  { %1601 = vmatprep.subr.bf16.mxu1 %v2747_v26 }
 0x105   :  { %2374 = vmatpush3.bf16.msra.mxu0 %v2754_v29 }
 0x106   :  { %1602 = vmatpush2.bf16.msra.mxu1 %v2745_v28  ;;  %2375 = vmatprep.subr.bf16.mxu0 %v2755_v31 }
 0x107   :  { %1626 = vmatprep.subr.bf16.mxu1 %v2750_v30 }
 0x109   :  { %1604 = vmatmul.mubr.bf16.vlgmr.msra.gmra.mxu1 %v3014_v20  ;;  %2376 = vmatpush3.bf16.msra.mxu0 %v2756_v33  ;;  %v2770_v20 = vld [vmem:[#allocation8 + $0xb0] sm:$0xff]  }
 0x10a   :  { %1627 = vmatpush1.bf16.msra.mxu1 %v2748_v32  ;;  %1644 = vmatprep.mubr.bf16.mxu1 %v2928_v16  ;;  %v2763_v16 = vld [vmem:[#allocation8 + $0x48] sm:$0xff]  }
 0x10b   :  { %2377 = vmatprep.subr.bf16.mxu0 %v2757_v34  ;;  %2393 = vmatprep.subr.bf16.mxu1 %v2767_v38  ;;  %v315_v38 = vsub.s32 4, %v306_v4 }
 0x10d   :  { %2378 = vmatpush3.bf16.msra.mxu0 %v2758_v9 }
 0x10e   :  { %2379 = vmatprep.subr.bf16.mxu0 %v2759_v35 }
 0x111   :  { %2330 = vmatmul.mubr.msk.bf16.vlgmr.msra.gmra.mxu1 %vm1321_vm0, %v3006_v19  ;;  %2380 = vmatpush3.bf16.msra.mxu0 %v2760_v37  ;;  %v2771_v19 = vld [vmem:[#allocation8 + $0xe8] sm:$0xff]  }
 0x112   :  { %2394 = vmatpush3.bf16.msra.mxu1 %v2768_v52  ;;  %2381 = vmatprep.subr.bf16.mxu0 %v2761_v40 }
 0x113   :  { %2395 = vmatprep.subr.bf16.mxu1 %v2769_v39  ;;  %v319_v39 = vsub.s32 6, %v306_v4  ;;  %v2787_v4 = vld [vmem:[#allocation10 + $0x18] sm:$0xff]  }
 0x115   :  { %2382 = vmatpush3.bf16.msra.mxu0 %v2762_v41 }
 0x116   :  { %2396 = vmatpush3.bf16.msra.mxu1 %v2770_v20  ;;  %2383 = vmatprep.subr.bf16.mxu0 %v2763_v16  ;;  %v316_v20 = vrot.slane %v303_v6, %v315_v38  ;;  %v320_v16 = vrot.slane %v303_v6, %v319_v39  ;;  %v2789_v6 = vld [vmem:[#allocation10 + $0x8] sm:$0xff]  }
 0x117   :  { %2397 = vmatprep.subr.bf16.mxu1 %v2771_v19 }
 0x119   :  { %2384 = vmatpush3.bf16.msra.mxu0 %v2764_v42 }
 0x11a   :  { %2385 = vmatprep.subr.bf16.mxu0 %v2765_v8  ;;  %2398 = vmatpush3.bf16.msra.mxu1 %v2772_v46  ;;  %v336_v8 = vrot.slane %v316_v20, %v3025_v7 }
 0x11b   :  { %2399 = vmatprep.subr.bf16.mxu1 %v2773_v48 }
 0x11d   :  { %2386 = vmatpush3.bf16.msra.mxu0 %v2766_v43 }
 0x11e   :  { %2400 = vmatpush3.bf16.msra.mxu1 %v2774_v49 }
 0x11f   :  { %2401 = vmatprep.subr.bf16.mxu1 %v2775_v56  ;;  %v2783_v56 = vld [vmem:[#allocation10 + $0x38] sm:$0xff]  }
 0x122   :  { %2402 = vmatpush3.bf16.msra.mxu1 %v2776_v57 }
 0x123   :  { %2403 = vmatprep.subr.bf16.mxu1 %v2777_v60 }
 0x126   :  { %2404 = vmatpush3.bf16.msra.mxu1 %v2778_v61  ;;  %v2784_v61 = vld [vmem:[#allocation10 + $0x30] sm:$0xff]  }
 0x127   :  { %2405 = vmatprep.subr.bf16.mxu1 %v2779_v63 }
 0x12a   :  { %2406 = vmatpush3.bf16.msra.mxu1 %v2780_v0 }
 0x12b   :  { %2407 = vmatprep.subr.bf16.mxu1 %v2781_v1 }
 0x12e   :  { %2408 = vmatpush3.bf16.msra.mxu1 %v2782_v2  ;;  %v2785_v2 = vld [vmem:[#allocation10 + $0x28] sm:$0xff]  }
 0x140   :  { %v1359_v44 = vpop.f32.mrf.mxu0 }
 0x141   :  { %v1400_v45 = vpop.f32.mrf.mxu1  ;;  %v1360_v15 = vadd.f32 %v1359_v44, %v328_v13  ;;  %v340_v44 = vrot.slane %v320_v16, %v3025_v7 }
 0x142   :  { %v1361_v36 = vpop.f32.mrf.mxu0 }
 0x143   :  { %v1402_v47 = vpop.f32.mrf.mxu1  ;;  %v1362_v17 = vadd.f32 %v1361_v36, %v332_v14  ;;  %v1401_v18 = vadd.f32 %v1400_v45, %v1360_v15 }
 0x144   :  { %v1363_v51 = vpop.f32.mrf.mxu0 }
 0x145   :  { %v1404_v50 = vpop.f32.mrf.mxu1  ;;  %v1403_v22 = vadd.f32 %v1402_v47, %v1362_v17  ;;  %v1725_v17 = vld [vmem:[%s3047_s4] sm:$0x1]  ;;  %s2931_s4 = smov [#allocation11]  }
 0x146   :  { %v1364_v54 = vpop.f32.mrf.mxu0  ;;  %s2122_s29 = sshll.u32 %s2931_s4, 4  ;;  %s2123_s29 = int_to_ptr.vmem [resolvable:$true] %s2122_s29 }
 0x147   :  { %v1405_v53 = vpop.f32.mrf.mxu1  ;;  %s2891_s30 = scalar_lea.vmem %s2123_s29, 128  ;;  %p2896_p12 = scmp.lt.s32.totalorder %s2123_s29, %s2123_s29 }
 0x148   :  { %p2892_p11 = scmp.ne.s32.totalorder %s2123_s29, %s2891_s30  ;;  %p2897_p13 = scmp.lt.s32.totalorder %s2891_s30, %s2891_s30 }
 0x149   :  { %v1482_v55 = vpop.f32.mrf.mxu1 }
 0x14a   :  { %p2898_p0 = por %p2897_p13, %p2896_p12 }
 0x14b   :  { %v1484_v58 = vpop.f32.mrf.mxu1 }
 0x14c   :  { %p2899_p1 = pnand %p2898_p0, %p2892_p11 }
 0x14d   :  { %v1486_v59 = vpop.f32.mrf.mxu1 }
 0x14f   :  { %v1487_v62 = vpop.f32.mrf.mxu1 }
 0x180   :  { %v1441_v21 = vpop.f32.mrf.mxu0 }
 0x181   :  { %v1442_v23 = vadd.f32 %v1441_v21, %v1401_v18  ;;  %v1726_v18 = vunpack.c.l.bf16 %v1725_v17 }
 0x182   :  { %v1443_v24 = vpop.f32.mrf.mxu0 }
 0x183   :  { %v1483_v25 = vadd.f32 %v1482_v55, %v1442_v23  ;;  %v1444_v26 = vadd.f32 %v1443_v24, %v1403_v22  ;;  %v1730_v21 = vrot.slane %v1726_v18, %v3025_v7 }
 0x184   :  { %v1445_v27 = vpop.f32.mrf.mxu0 }
 0x185   :  { %v1485_v28 = vadd.f32 %v1484_v58, %v1444_v26  ;;  %v1653_v29 = vmax.f32 %v1483_v25, 0.0  ;;  %v2929_v58 = vmov 0.0  }
 0x186   :  { %v1446_v30 = vpop.f32.mrf.mxu0  ;;  %2424 = vmatprep.subr.bf16.mxu0 %v2929_v58 }
 0x187   :  { %v1654_v31 = vmax.f32 %v1485_v28, 0.0  ;;  %v1657_v34 = vpack.c.bf16 %v1653_v29, %v1653_v29 }
 0x189   :  { %v1523_v32 = vpop.f32.mrf.mxu1  ;;  %v1658_v33 = vpack.c.bf16 %v1654_v31, %v1654_v31  ;;  %v2021_v31 = vld [vmem:[%s3049_s6] sm:$0x1] }
 0x18a   :  { %v1524_v19 = vadd.f32 %v1523_v32, %v336_v8  ;;  %v2022_v32 = vunpack.c.l.bf16 %v2021_v31 }
 0x18b   :  { %v1525_v9 = vpop.f32.mrf.mxu1  ;;  %1955 = vmatprep.mubr.bf16.mxu0 %v1658_v33 }
 0x18c   :  { %1956 = vmatmul.mubr.bf16.vlgmr.msra.gmra.mxu0 %v1657_v34  ;;  %v1526_v36 = vadd.f32 %v1525_v9, %v340_v44  ;;  %v2026_v33 = vrot.slane %v2022_v32, %v3025_v7 }
 0x18d   :  { %v1527_v35 = vpop.f32.mrf.mxu1  ;;  %2425 = vmatpush3.bf16.msra.mxu0 %v2783_v56  ;;  %2440 = vmatprep.mubr.msk.bf16.mxu0 %vm2930_vm1, %v2929_v58 }
 0x18e   :  { %2426 = vmatprep.subr.bf16.mxu0 %v2929_v58 }
 0x18f   :  { %v1528_v37 = vpop.f32.mrf.mxu1 }
 0x191   :  { %2427 = vmatpush3.bf16.msra.mxu0 %v2784_v61 }
 0x192   :  { %2428 = vmatprep.subr.bf16.mxu0 %v2929_v58 }
 0x195   :  { %2429 = vmatpush3.bf16.msra.mxu0 %v2785_v2 }
 0x196   :  { %2430 = vmatprep.subr.bf16.mxu0 %v2929_v58 }
 0x199   :  { %2431 = vmatpush3.bf16.msra.mxu0 %v2786_v3 }
 0x19a   :  { %2432 = vmatprep.subr.bf16.mxu0 %v2929_v58 }
 0x19d   :  { %2433 = vmatpush3.bf16.msra.mxu0 %v2787_v4 }
 0x19e   :  { %2434 = vmatprep.subr.bf16.mxu0 %v2929_v58 }
 0x1a1   :  { %2435 = vmatpush3.bf16.msra.mxu0 %v2788_v5 }
 0x1a2   :  { %2436 = vmatprep.subr.bf16.mxu0 %v2929_v58 }
 0x1a5   :  { %2437 = vmatpush3.bf16.msra.mxu0 %v2789_v6 }
 0x1a6   :  { %2438 = vmatprep.subr.bf16.mxu0 %v2929_v58 }
 0x1a9   :  { %2439 = vmatpush3.bf16.msra.mxu0 %v2790_v10 }
 0x1c0   :  { %v1564_v52 = vpop.f32.mrf.mxu0 }
 0x1c1   :  { %v1565_v47 = vadd.f32 %v1564_v52, %v1524_v19 }
 0x1c2   :  { %v1566_v40 = vpop.f32.mrf.mxu0 }
 0x1c3   :  { %v1567_v49 = vadd.f32 %v1566_v40, %v1526_v36 }
 0x1c4   :  { %v1568_v41 = vpop.f32.mrf.mxu0 }
 0x1c6   :  { %v1569_v42 = vpop.f32.mrf.mxu0 }
 0x1c9   :  { %v1605_v43 = vpop.f32.mrf.mxu1 }
 0x1ca   :  { %v1606_v50 = vadd.f32 %v1605_v43, %v1565_v47 }
 0x1cb   :  { %v1607_v45 = vpop.f32.mrf.mxu1 }
 0x1cc   :  { %v1608_v53 = vadd.f32 %v1607_v45, %v1567_v49 }
 0x1cd   :  { %v1609_v46 = vpop.f32.mrf.mxu1 }
 0x1cf   :  { %v1610_v48 = vpop.f32.mrf.mxu1 }
 0x1d1   :  { %v1646_v51 = vpop.f32.mrf.mxu1 }
 0x1d2   :  { %v1647_v54 = vadd.f32 %v1646_v51, %v1606_v50 }
 0x1d3   :  { %v1648_v55 = vpop.f32.mrf.mxu1 }
 0x1d4   :  { %v1649_v57 = vadd.f32 %v1648_v55, %v1608_v53  ;;  %v1655_v59 = vmax.f32 %v1647_v54, 0.0 }
 0x1d5   :  { %v1650_v60 = vpop.f32.mrf.mxu1 }
 0x1d6   :  { %v1656_v62 = vmax.f32 %v1649_v57, 0.0  ;;  %v1659_v1 = vpack.c.bf16 %v1655_v59, %v1655_v59 }
 0x1d7   :  { %v1651_v63 = vpop.f32.mrf.mxu1 }
 0x1d8   :  { %v1660_v0 = vpack.c.bf16 %v1656_v62, %v1656_v62 }
 0x1da   :  { %1995 = vmatprep.mubr.bf16.mxu1 %v1660_v0 }
 0x1db   :  { %1996 = vmatmul.mubr.bf16.vlgmr.msra.gmra.mxu1 %v1659_v1 }
 0x24c   :  { %v2387_v11 = vpop.f32.mrf.mxu0 }
 0x24e   :  { %v2388_v12 = vpop.f32.mrf.mxu0 }
 0x24f   :  { %v2389_v13 = vadd.f32 %v2388_v12, %v2387_v11 }
 0x250   :  { %v2390_v14 = vpop.f32.mrf.mxu0 }
 0x251   :  { %v1958_v24 = vadd.f32 %v2389_v13, %v1730_v21 }
 0x252   :  { %v2391_v15 = vpop.f32.mrf.mxu0 }
 0x29b   :  { %v2409_v22 = vpop.f32.mrf.mxu1 }
 0x29d   :  { %v2410_v23 = vpop.f32.mrf.mxu1 }
 0x29e   :  { %v2411_v25 = vadd.f32 %v2410_v23, %v2409_v22 }
 0x29f   :  { %v2412_v26 = vpop.f32.mrf.mxu1 }
 0x2a0   :  { %v1998_v27 = vadd.f32 %v2411_v25, %v1958_v24 }
 0x2a1   :  { %v2413_v28 = vpop.f32.mrf.mxu1 }
 0x2a2   :  { %v2003_v29 = vmax.f32 %v1998_v27, 0.0 }
 0x2a4   :  { %v2004_v30 = vpack.c.bf16 %v2003_v29, %v2003_v29 }
 0x2a6   :  { %2441 = vmatmul.mubr.bf16.vlgmr.msra.gmra.mxu0 %v2004_v30 }
 0x366   :  { %v2109_v34 = vpop.f32.mrf.mxu0 }
 0x367   :  { %v2110_v9 = vadd.f32 %v2109_v34, %v2026_v33 }
 0x368   :  { %v2442_v35 = vpop.f32.mrf.mxu0 }
 0x369   :  { %2115 = vst [vmem:[#allocation11] sm:$0xff] %v2110_v9 }
 0x36a   :  { %v2112_v37 = vpop.f32.mrf.mxu0 }
 0x36b   :  { %2902 = shalt.err (!%p2899_p1)
}
 0x36c   :  { %2125 = dma.vmem_to_hbm [thread:$0]  %s2123_s29, 128, %s3050_s7, [#allocation4]   ;;  %v2443_v7 = vpop.f32.mrf.mxu0 }
 0x36d   :  { %2917 = dma.done.wait [#allocation4], 128  }
 0x36e   :  { %2918 = vsyncadd [#allocation4], 4294967168 }
 0x36f   :  { %2129 = vsyncpa [#allocation3], 1 }
 0x370   :  { %2130 = vsyncpa [#allocation6], 1 }
 0x371   :  { %2131 = vsyncpa [#allocation9], 1 }
 0x372   :  { %2132 = vsyncpa [#allocation4], 1 }

</bundles_post_ra>
